<compile_context>
chip_gen: v6e
topology: v6e:2x2x1
jax: 0.10.0
libtpu: 0.0.40
codegen_flags: <defaults>
</compile_context>

<pallas_src>
import jax
import jax.numpy as jnp
from jax.experimental import pallas as pl
from jax.experimental.pallas import tpu as pltpu


def _round_up(x, m):
    return (x + m - 1) // m * m


def _pick_tile(extent, unit, target):
    """Tile size for one axis.

    If the extent is <= the hardware unit, use the full extent (allowed: the
    block dim then equals the full array dim).  Otherwise use a unit-aligned
    tile capped at `target`; a non-dividing edge block is handled by Pallas
    with clipped reads / masked stores.
    """
    if extent <= unit:
        return extent
    return min(_round_up(target, unit), _round_up(extent, unit))


def _scale_relu_kernel(x_ref, w_ref, b_ref, o_ref):
    # x_ref: (TR, TL); w_ref/b_ref: (TR, 1) -> broadcast along the lane axis.
    y = x_ref[...] * w_ref[...] + b_ref[...]
    o_ref[...] = jnp.maximum(y, 0).astype(o_ref.dtype)


def scale_relu(x_nchw, weight, bias, *, tr_target=256, tl_target=2048):
    """x_nchw: (N, C, H, W); weight/bias: (1, C, 1, 1) — matches the PyTorch module."""
    N, C, H, W = x_nchw.shape
    R, L = N * C, H * W
    dtype = x_nchw.dtype

    # Row-major flatten of contiguous dims: a free bitcast, no HBM copy.
    x2d = x_nchw.reshape(R, L)
    # Per-channel params broadcast over the batch dim: one scalar per row,
    # (N*C, 1).  Row r of x2d corresponds to channel r % C, matching this layout.
    w2d = jnp.broadcast_to(weight.reshape(1, C), (N, C)).reshape(R, 1).astype(dtype)
    b2d = jnp.broadcast_to(bias.reshape(1, C), (N, C)).reshape(R, 1).astype(dtype)

    TR = _pick_tile(R, 8, tr_target)     # sublane tile
    TL = _pick_tile(L, 128, tl_target)   # lane tile (kept wide -> lane-dense vst)
    grid = (pl.cdiv(R, TR), pl.cdiv(L, TL))

    out2d = pl.pallas_call(
        _scale_relu_kernel,
        out_shape=jax.ShapeDtypeStruct((R, L), dtype),
        grid_spec=pl.GridSpec(
            grid=grid,
            in_specs=[
                pl.BlockSpec((TR, TL), lambda i, j: (i, j)),   # x tile
                pl.BlockSpec((TR, 1), lambda i, j: (i, 0)),    # per-row scale
                pl.BlockSpec((TR, 1), lambda i, j: (i, 0)),    # per-row bias
            ],
            out_specs=pl.BlockSpec((TR, TL), lambda i, j: (i, j)),
        ),
        compiler_params=pltpu.CompilerParams(
            dimension_semantics=("parallel", "parallel"),
        ),
    )(x2d, w2d, b2d)

    return out2d.reshape(N, C, H, W)


if __name__ == "__main__":
    key = jax.random.PRNGKey(0)

    def check(N, C, H, W):
        kx = jax.random.fold_in(key, N * 1000 + C * 100 + H * W)
        x = jax.random.normal(kx, (N, C, H, W), dtype=jnp.float32)

        # Non-trivial per-channel params so the channel broadcast is exercised
        # (the module's reset_parameters default of weight=1, bias=0 would hide
        #  a broadcast bug).
        weight = jnp.arange(1, C + 1, dtype=jnp.float32).reshape(1, C, 1, 1) * 0.5
        bias = jnp.linspace(-0.5, 0.5, C, dtype=jnp.float32).reshape(1, C, 1, 1)

        y = scale_relu(x, weight, bias)
        jax.block_until_ready(y)

        ref = jnp.maximum(x * weight + bias, 0.0)
        assert y.shape == ref.shape and y.dtype == ref.dtype
        assert jnp.allclose(y, ref, atol=1e-6), f"mismatch vs reference for {(N, C, H, W)}"

    # Aligned small shape (matches the module's intended 4-D NCHW input).
    check(2, 4, 16, 16)
    # Non-(8,128)-aligned spatial size: exercises the partial (masked) lane-edge block.
    check(2, 4, 14, 14)
    # Rows not a multiple of 8 AND lanes not a multiple of 128: partial blocks on both axes.
    check(3, 5, 14, 14)
    # Multi-block grid along the lane axis.
    check(2, 16, 64, 64)

    print("KERNEL_OK")
</pallas_src>

<mosaic_0001>
module attributes {stable_mosaic.version = 11 : i64} {
  func.func @_scale_relu_kernel(%arg0: i32, %arg1: i32, %arg2: memref<8x256xf32, #tpu.memory_space<vmem>>, %arg3: memref<8x1xf32, #tpu.memory_space<vmem>>, %arg4: memref<8x1xf32, #tpu.memory_space<vmem>>, %arg5: memref<8x256xf32, #tpu.memory_space<vmem>>) attributes {dimension_semantics = [#tpu.dimension_semantics<parallel>, #tpu.dimension_semantics<parallel>], iteration_bounds = array<i64: 1, 1>, scalar_prefetch = 0 : i64, scratch_operands = 0 : i64, tpu.core_type = #tpu.core_type<tc>, window_params = [{transform_indices = @transform_0, window_bounds = array<i64: 8, 256>}, {transform_indices = @transform_1, window_bounds = array<i64: 8, 1>}, {transform_indices = @transform_2, window_bounds = array<i64: 8, 1>}, {transform_indices = @transform_3, window_bounds = array<i64: 8, 256>}]} {
    %c0 = arith.constant 0 : index
    %c0_0 = arith.constant 0 : index
    %0 = vector.load %arg2[%c0, %c0_0] : memref<8x256xf32, #tpu.memory_space<vmem>>, vector<8x256xf32>
    %c0_1 = arith.constant 0 : index
    %c0_2 = arith.constant 0 : index
    %1 = vector.load %arg3[%c0_1, %c0_2] : memref<8x1xf32, #tpu.memory_space<vmem>>, vector<8x1xf32>
    %2 = vector.broadcast %1 : vector<8x1xf32> to vector<8x256xf32>
    %3 = arith.mulf %0, %2 : vector<8x256xf32>
    %c0_3 = arith.constant 0 : index
    %c0_4 = arith.constant 0 : index
    %4 = vector.load %arg4[%c0_3, %c0_4] : memref<8x1xf32, #tpu.memory_space<vmem>>, vector<8x1xf32>
    %5 = vector.broadcast %4 : vector<8x1xf32> to vector<8x256xf32>
    %6 = arith.addf %3, %5 : vector<8x256xf32>
    %cst = arith.constant 0.000000e+00 : f32
    %7 = vector.broadcast %cst : f32 to vector<8x256xf32>
    %8 = arith.maximumf %6, %7 : vector<8x256xf32>
    %c0_5 = arith.constant 0 : index
    %c0_6 = arith.constant 0 : index
    %9 = vector.load %arg5[%c0_5, %c0_6] : memref<8x256xf32, #tpu.memory_space<vmem>>, vector<8x256xf32>
    tpu.vector_store %arg5[%c0_5, %c0_6], %8 {strides = array<i32>} : memref<8x256xf32, #tpu.memory_space<vmem>>, vector<8x256xf32>,
    return
  }
  func.func @transform_0(%arg0: i32, %arg1: i32) -> (i32, i32) {
    %c0_i32 = arith.constant 0 : i32
    return %arg0, %arg1 : i32, i32
  }
  func.func @transform_1(%arg0: i32, %arg1: i32) -> (i32, i32) {
    %c0_i32 = arith.constant 0 : i32
    %c0_i32_0 = arith.constant 0 : i32
    return %arg0, %c0_i32 : i32, i32
  }
  func.func @transform_2(%arg0: i32, %arg1: i32) -> (i32, i32) {
    %c0_i32 = arith.constant 0 : i32
    %c0_i32_0 = arith.constant 0 : i32
    return %arg0, %c0_i32 : i32, i32
  }
  func.func @transform_3(%arg0: i32, %arg1: i32) -> (i32, i32) {
    %c0_i32 = arith.constant 0 : i32
    return %arg0, %arg1 : i32, i32
  }
}

</mosaic_0001>

<bundles_post_ra>
// kernel: tpu_custom_call.1
= control target key start
LH: loop header
LB: loop body
LE: loop exit
PB: predicated region body
PF: predicated region fallthrough
CT: control target
= control target key end

     0   :  { %v76_v1 = vmov 0   ;;  %s113_s0 = inlined_call_operand.vmem [shape: f32[8,256], index: 0, kind: input, shape index: {}]   ;;  %s114_s1 = inlined_call_operand.vmem [shape: f32[8,1], index: 1, kind: input, shape index: {}]   ;;  %s115_s2 = inlined_call_operand.vmem [shape: f32[8,1], index: 2, kind: input, shape index: {}]   ;;  %s116_s3 = inlined_call_operand.hbm [shape: f32[8,256], index: 3, kind: output, shape index: {}]  }
   0x1   :  { %v17_v0 = vld [vmem:[%s114_s1] sm:$0xff]  ;;  %53 = vset.pattern.permute.xlu0 %v76_v1 }
   0x2   :  { %8 = vsyncpa [#allocation3], 0  ;;  %20 = vperm.xlu0 %53, %v17_v0   ;;  %v25_v2 = vld [vmem:[%s115_s2] sm:$0xff]  ;;  %v16_v5 = vld [vmem:[%s113_s0 + $0x8] sm:$0xff]  ;;  %s77_s1 = smov [#allocation2]  }
   0x3   :  { %v15_v4 = vld [vmem:[%s113_s0] sm:$0xff]  ;;  %s43_s20 = sshll.u32 %s77_s1, 4  ;;  %s44_s20 = int_to_ptr.vmem [resolvable:$true] %s43_s20 }
   0x4   :  { %s54_s2 = scalar_lea.vmem %s44_s20, 256  ;;  %p59_p1 = scmp.lt.s32.totalorder %s44_s20, %s44_s20 }
   0x5   :  { %p55_p0 = scmp.ne.s32.totalorder %s44_s20, %s54_s2  ;;  %p60_p2 = scmp.lt.s32.totalorder %s54_s2, %s54_s2 }
   0x6   :  { %28 = vperm.xlu0 %53, %v25_v2  }
   0x7   :  { %p61_p3 = por %p60_p2, %p59_p1 }
   0x9   :  { %p62_p4 = pnand %p61_p3, %p55_p0 }
  0x7d   :  { %v21_v3 = vpop.permute.xlu0 %20 }
  0x7e   :  { %v23_v6 = vmul.f32 %v21_v3, %v15_v4  ;;  %v24_v7 = vmul.f32 %v21_v3, %v16_v5 }
  0x81   :  { %v29_v8 = vpop.permute.xlu0 %28 }
  0x82   :  { %v31_v9 = vadd.f32 %v29_v8, %v23_v6  ;;  %v32_v10 = vadd.f32 %v29_v8, %v24_v7 }
  0x84   :  { %v33_v11 = vmax.f32 %v31_v9, 0.0  ;;  %v34_v12 = vmax.f32 %v32_v10, 0.0 }
  0x86   :  { %35 = vst [vmem:[#allocation2] sm:$0xff] %v33_v11  ;;  %36 = vst [vmem:[#allocation2 + $0x8] sm:$0xff] %v34_v12 }
  0x87   :  { %65 = shalt.err (!%p62_p4)
}
  0x88   :  { %46 = dma.vmem_to_hbm [thread:$0]  %s44_s20, 256, %s116_s3, [#allocation3]  }
  0x89   :  { %74 = dma.done.wait [#allocation3], 256  }
  0x8a   :  { %75 = vsyncadd [#allocation3], 4294967040 }
  0x8b   :  { %50 = vsyncpa [#allocation3], 1 }

</bundles_post_ra>
